<compile_context>
chip_gen: v7x
topology: tpu7x:2x2x1
jax: 0.10.0
libtpu: 0.0.40
codegen_flags: <defaults>
</compile_context>

<pallas_src>
import functools
import math

import jax
import jax.numpy as jnp
from jax.experimental import pallas as pl
from jax.experimental.pallas import tpu as pltpu


# -----------------------------------------------------------------------------
# Kernel
# -----------------------------------------------------------------------------

def _layernorm_kernel(x_ref, w_ref, *rest, eps, has_bias, bf16_affine):
    """LayerNorm over the last dim of a (block_rows, C) tile.

    x_ref: (R, C)   w_ref / b_ref: (1, C)   o_ref: (R, C)
    """
    if has_bias:
        b_ref, o_ref = rest
    else:
        (o_ref,) = rest

    x = x_ref[...]                                    # native dtype
    xf = x.astype(jnp.float32)                        # f32 for statistics
    c = xf.shape[-1]
    inv_c = 1.0 / c

    # Two-pass (centered) statistics, all in f32; rsqrt goes to the EUP.
    mu = jnp.sum(xf, axis=-1, keepdims=True) * inv_c              # (R, 1)
    d = xf - mu                                                    # (R, C) f32
    var = jnp.sum(d * d, axis=-1, keepdims=True) * inv_c           # (R, 1)
    rstd = jax.lax.rsqrt(var + eps)                                # (R, 1)

    wf = w_ref[...].astype(jnp.float32)                            # (1, C)
    scale = rstd * wf                                              # fused scale

    if bf16_affine:
        # Final affine in the input dtype (bf16 VALUs on v6e/v7x); stats stayed f32.
        out = (x - mu.astype(x.dtype)) * scale.astype(x.dtype)
        if has_bias:
            out = out + b_ref[...].astype(x.dtype)
        o_ref[...] = out.astype(o_ref.dtype)
    else:
        out = d * scale                                            # reuse centered x
        if has_bias:
            out = out + b_ref[...].astype(jnp.float32)
        o_ref[...] = out.astype(o_ref.dtype)


# -----------------------------------------------------------------------------
# Wrapper
# -----------------------------------------------------------------------------

def _round_up(v, m):
    return ((v + m - 1) // m) * m


def _is_v5():
    try:
        kind = jax.devices()[0].device_kind.lower()
        return "v5" in kind
    except Exception:  # pragma: no cover - perf heuristic only
        return False


def layer_norm(x, weight, bias=None, eps=1e-5, block_rows=None):
    """F.layer_norm(x, (C,), weight, bias, eps) over the last dim of x."""
    orig_shape = x.shape
    c = orig_shape[-1]
    assert weight.shape == (c,)
    if bias is not None:
        assert bias.shape == (c,)

    n_rows = 1
    for d in orig_shape[:-1]:
        n_rows *= d
    n_rows = max(n_rows, 1)
    x2 = x.reshape(n_rows, c)

    itemsize = x.dtype.itemsize
    # Per-grid-step VMEM cost of one row:
    #   in + out tiles, double buffered, at the input itemsize
    #   + ~3 tile-sized f32 temporaries (x_f32, centered x, pre-cast out).
    io_per_row = 2 * 2 * c * itemsize
    scratch_per_row = 3 * c * 4
    per_row = io_per_row + scratch_per_row

    if block_rows is None:
        budget = 12 * 1024 * 1024                      # I/O + scratch per step
        cap_rows = max(8, (budget // max(per_row, 1)) // 8 * 8)
        steps8_rows = max(8, _round_up(-(-n_rows // 8), 8))   # >=8 grid steps
        # Prefer the >=512-row sweet spot, but shrink to n_rows/8 when rows are
        # plentiful so v7x gets >=4 pipelined steps per TensorCore.
        block_rows = min(cap_rows, max(512, steps8_rows))
    block_rows = max(8, (block_rows // 8) * 8)
    if block_rows >= n_rows:
        block_rows = n_rows                            # single full-extent block

    grid = (pl.cdiv(n_rows, block_rows),)              # partial last block is masked

    has_bias = bias is not None
    bf16_affine = (x.dtype == jnp.bfloat16) and not _is_v5()

    in_specs = [
        pl.BlockSpec((block_rows, c), lambda i: (i, 0)),   # x rows tile
        pl.BlockSpec((1, c), lambda i: (0, 0)),            # weight (constant)
    ]
    args = [x2, weight.reshape(1, c)]
    if has_bias:
        in_specs.append(pl.BlockSpec((1, c), lambda i: (0, 0)))
        args.append(bias.reshape(1, c))

    # Explicit, dtype-aware scoped-VMEM limit (with headroom), clamped to a range
    # that is safe on every generation (v7x: 64 MiB physical per TC).
    io_bytes = 2 * 2 * block_rows * c * itemsize
    scratch_bytes = 3 * block_rows * c * 4
    param_bytes = 2 * c * weight.dtype.itemsize * (2 if has_bias else 1)
    vmem_limit = int(1.5 * (io_bytes + scratch_bytes + param_bytes)) + (2 << 20)
    vmem_limit = min(max(vmem_limit, 16 << 20), 40 << 20)

    out = pl.pallas_call(
        functools.partial(_layernorm_kernel, eps=eps, has_bias=has_bias,
                          bf16_affine=bf16_affine),
        out_shape=jax.ShapeDtypeStruct((n_rows, c), x.dtype),
        grid=grid,
        in_specs=in_specs,
        out_specs=pl.BlockSpec((block_rows, c), lambda i: (i, 0)),
        compiler_params=pltpu.CompilerParams(
            dimension_semantics=("parallel",),
            vmem_limit_bytes=vmem_limit),
    )(*args)

    return out.reshape(orig_shape)


# -----------------------------------------------------------------------------
if __name__ == "__main__":
    key = jax.random.PRNGKey(0)
    kx, kw, kb, kx2 = jax.random.split(key, 4)

    def ref_layer_norm(x, w, b, eps=1e-5):
        xf = x.astype(jnp.float32)
        mu = jnp.mean(xf, axis=-1, keepdims=True)
        var = jnp.mean((xf - mu) ** 2, axis=-1, keepdims=True)
        y = (xf - mu) * jax.lax.rsqrt(var + eps) * w.astype(jnp.float32)
        if b is not None:
            y = y + b.astype(jnp.float32)
        return y.astype(x.dtype)

    # Small, lane-dense shapes: (B, T, C) = (2, 8, 128), normalize over C.
    B, T, C = 2, 8, 128
    x = jax.random.normal(kx, (B, T, C), jnp.float32)
    weight = 1.0 + 0.1 * jax.random.normal(kw, (C,), jnp.float32)
    bias = 0.1 * jax.random.normal(kb, (C,), jnp.float32)

    y_bias = layer_norm(x, weight, bias)       # LayerNorm(ndim, bias=True)
    y_nobias = layer_norm(x, weight, None)     # LayerNorm(ndim, bias=False)
    jax.block_until_ready((y_bias, y_nobias))

    assert y_bias.shape == x.shape and y_nobias.shape == x.shape
    assert jnp.allclose(y_bias, ref_layer_norm(x, weight, bias),
                        atol=1e-5, rtol=1e-5)
    assert jnp.allclose(y_nobias, ref_layer_norm(x, weight, None),
                        atol=1e-5, rtol=1e-5)

    # Non-dividing row count with an explicit small tile to exercise the
    # masked partial last block (21 rows, block_rows=8 -> grid of 3).
    xr = jax.random.normal(kx2, (3, 7, C), jnp.float32)
    y_partial = layer_norm(xr, weight, bias, block_rows=8)
    jax.block_until_ready(y_partial)
    assert jnp.allclose(y_partial, ref_layer_norm(xr, weight, bias),
                        atol=1e-5, rtol=1e-5)

    # bf16 path (f32 stats, bf16 affine on v6e/v7x; all-f32 on v5e).
    xb = x.astype(jnp.bfloat16)
    wb = weight.astype(jnp.bfloat16)
    bb = bias.astype(jnp.bfloat16)
    y_bf16 = layer_norm(xb, wb, bb)
    jax.block_until_ready(y_bf16)
    assert jnp.allclose(y_bf16.astype(jnp.float32),
                        ref_layer_norm(xb, wb, bb).astype(jnp.float32),
                        atol=3e-2, rtol=3e-2)

    print("KERNEL_OK")
</pallas_src>

<mosaic_0001>
module attributes {stable_mosaic.version = 11 : i64} {
  func.func @_layernorm_kernel(%arg0: i32, %arg1: memref<16x128xf32, #tpu.memory_space<vmem>>, %arg2: memref<1x128xf32, #tpu.memory_space<vmem>>, %arg3: memref<1x128xf32, #tpu.memory_space<vmem>>, %arg4: memref<16x128xf32, #tpu.memory_space<vmem>>) attributes {dimension_semantics = [#tpu.dimension_semantics<parallel>], iteration_bounds = array<i64: 1>, scalar_prefetch = 0 : i64, scratch_operands = 0 : i64, tpu.core_type = #tpu.core_type<tc>, window_params = [{transform_indices = @transform_0, window_bounds = array<i64: 16, 128>}, {pipeline_mode = #tpu.pipeline_mode<synchronous>, transform_indices = @transform_1, window_bounds = array<i64: 1, 128>}, {pipeline_mode = #tpu.pipeline_mode<synchronous>, transform_indices = @transform_2, window_bounds = array<i64: 1, 128>}, {transform_indices = @transform_3, window_bounds = array<i64: 16, 128>}]} {
    %c0 = arith.constant 0 : index
    %c0_0 = arith.constant 0 : index
    %0 = vector.load %arg1[%c0, %c0_0] : memref<16x128xf32, #tpu.memory_space<vmem>>, vector<16x128xf32>
    %cst = arith.constant dense<0.000000e+00> : vector<16xf32>
    %1 = vector.multi_reduction <add>, %0, %cst [1] : vector<16x128xf32> to vector<16xf32>
    %2 = vector.shape_cast %1 : vector<16xf32> to vector<16x1xf32>
    %cst_1 = arith.constant 7.812500e-03 : f32
    %3 = vector.broadcast %cst_1 : f32 to vector<16x1xf32>
    %4 = arith.mulf %2, %3 : vector<16x1xf32>
    %5 = vector.broadcast %4 : vector<16x1xf32> to vector<16x128xf32>
    %6 = arith.subf %0, %5 : vector<16x128xf32>
    %7 = arith.mulf %6, %6 : vector<16x128xf32>
    %cst_2 = arith.constant dense<0.000000e+00> : vector<16xf32>
    %8 = vector.multi_reduction <add>, %7, %cst_2 [1] : vector<16x128xf32> to vector<16xf32>
    %9 = vector.shape_cast %8 : vector<16xf32> to vector<16x1xf32>
    %cst_3 = arith.constant 7.812500e-03 : f32
    %10 = vector.broadcast %cst_3 : f32 to vector<16x1xf32>
    %11 = arith.mulf %9, %10 : vector<16x1xf32>
    %cst_4 = arith.constant 9.99999974E-6 : f32
    %12 = vector.broadcast %cst_4 : f32 to vector<16x1xf32>
    %13 = arith.addf %11, %12 : vector<16x1xf32>
    %14 = math.rsqrt %13 : vector<16x1xf32>
    %c0_5 = arith.constant 0 : index
    %c0_6 = arith.constant 0 : index
    %15 = vector.load %arg2[%c0_5, %c0_6] : memref<1x128xf32, #tpu.memory_space<vmem>>, vector<1x128xf32>
    %16 = vector.broadcast %14 : vector<16x1xf32> to vector<16x128xf32>
    %17 = vector.broadcast %15 : vector<1x128xf32> to vector<16x128xf32>
    %18 = arith.mulf %16, %17 : vector<16x128xf32>
    %19 = arith.mulf %6, %18 : vector<16x128xf32>
    %c0_7 = arith.constant 0 : index
    %c0_8 = arith.constant 0 : index
    %20 = vector.load %arg3[%c0_7, %c0_8] : memref<1x128xf32, #tpu.memory_space<vmem>>, vector<1x128xf32>
    %21 = vector.broadcast %20 : vector<1x128xf32> to vector<16x128xf32>
    %22 = arith.addf %19, %21 : vector<16x128xf32>
    %c0_9 = arith.constant 0 : index
    %c0_10 = arith.constant 0 : index
    %23 = vector.load %arg4[%c0_9, %c0_10] : memref<16x128xf32, #tpu.memory_space<vmem>>, vector<16x128xf32>
    tpu.vector_store %arg4[%c0_9, %c0_10], %22 {strides = array<i32>} : memref<16x128xf32, #tpu.memory_space<vmem>>, vector<16x128xf32>,
    return
  }
  func.func @transform_0(%arg0: i32) -> (i32, i32) {
    %c0_i32 = arith.constant 0 : i32
    %c0_i32_0 = arith.constant 0 : i32
    return %arg0, %c0_i32 : i32, i32
  }
  func.func @transform_1(%arg0: i32) -> (i32, i32) {
    %c0_i32 = arith.constant 0 : i32
    %c0_i32_0 = arith.constant 0 : i32
    %c0_i32_1 = arith.constant 0 : i32
    return %c0_i32, %c0_i32_0 : i32, i32
  }
  func.func @transform_2(%arg0: i32) -> (i32, i32) {
    %c0_i32 = arith.constant 0 : i32
    %c0_i32_0 = arith.constant 0 : i32
    %c0_i32_1 = arith.constant 0 : i32
    return %c0_i32, %c0_i32_0 : i32, i32
  }
  func.func @transform_3(%arg0: i32) -> (i32, i32) {
    %c0_i32 = arith.constant 0 : i32
    %c0_i32_0 = arith.constant 0 : i32
    return %arg0, %c0_i32 : i32, i32
  }
}

</mosaic_0001>

<bundles_post_ra>
// kernel: tpu_custom_call.1
= control target key start
LH: loop header
LB: loop body
LE: loop exit
PB: predicated region body
PF: predicated region fallthrough
CT: control target
= control target key end

     0   :  { %8 = vsyncpa [#allocation3], 0  ;;  %s208_s0 = inlined_call_operand.hbm [shape: f32[16,128], index: 0, kind: input, shape index: {}]   ;;  %s209_s1 = inlined_call_operand.vmem [shape: f32[1,128], index: 1, kind: input, shape index: {}]   ;;  %s210_s2 = inlined_call_operand.vmem [shape: f32[1,128], index: 2, kind: input, shape index: {}]   ;;  %s211_s3 = inlined_call_operand.hbm [shape: f32[16,128], index: 3, kind: output, shape index: {}]  }
   0x1   :  { %9 = vsyncpa [#allocation4], 0  ;;  %s148_s12 = smov [#allocation2]   ;;  %s100_s16 = scalar_lea.hbm %s208_s0, 256 }
   0x2   :  { %s15_s13 = sshll.u32 %s148_s12, 4  ;;  %p101_p0 = scmp.ne.s32.totalorder %s208_s0, %s100_s16  ;;  %s16_s13 = int_to_ptr.vmem [resolvable:$true] %s15_s13 }
   0x3   :  { %p104_p1 = scmp.lt.u32.totalorder %s100_s16, %s208_s0 }
   0x5   :  { %p106_p2 = pnand %p104_p1, %p101_p0 }
   0x7   :  { %109 = shalt.err (!%p106_p2)
}
   0x8   :  { %s110_s21 = scalar_lea.vmem %s16_s13, 256  ;;  %p115_p4 = scmp.lt.s32.totalorder %s16_s13, %s16_s13 }
   0x9   :  { %p111_p3 = scmp.ne.s32.totalorder %s16_s13, %s110_s21  ;;  %p116_p5 = scmp.lt.s32.totalorder %s110_s21, %s110_s21 }
   0xb   :  { %p117_p6 = por %p116_p5, %p115_p4 }
   0xd   :  { %p118_p7 = pnand %p117_p6, %p111_p3 }
   0xf   :  { %121 = shalt.err (!%p118_p7)
}
  0x10   :  { %s149_s22 = smov 128   ;;  %s150_s23 = smov 8  }
  0x11   :  { %21 = dma.hbm_to_vmem [thread:$0]  %s208_s0, 256, %s16_s13, [#allocation3], %s149_s22, %s149_s22, %s150_s23  }
  0x12   :  { %144 = dma.done.wait [#allocation3], 256  }
  0x13   :  { %145 = vsyncadd [#allocation3], 4294967040  ;;  %v29_v0 = vld [vmem:[#allocation2] sm:$0xff]  ;;  %v30_v1 = vld [vmem:[#allocation2 + $0x8] sm:$0xff]  ;;  %s151_s29 = smov [#allocation5]  }
  0x14   :  { %31 = vadd.xlane.f32.xlu0 %v29_v0  ;;  %v90_v16 = vld [vmem:[%s209_s1] ss:$0 sm:$0xff]  ;;  %s78_s30 = sshll.u32 %s151_s29, 4  ;;  %s79_s30 = int_to_ptr.vmem [resolvable:$true] %s78_s30 }
  0x15   :  { %v91_v19 = vld [vmem:[%s210_s2] ss:$0 sm:$0xff]  ;;  %s122_s4 = scalar_lea.vmem %s79_s30, 256  ;;  %p127_p9 = scmp.lt.s32.totalorder %s79_s30, %s79_s30 }
  0x16   :  { %p123_p8 = scmp.ne.s32.totalorder %s79_s30, %s122_s4  ;;  %p128_p10 = scmp.lt.s32.totalorder %s122_s4, %s122_s4 }
  0x18   :  { %33 = vadd.xlane.f32.xlu0 %v30_v1  ;;  %p129_p11 = por %p128_p10, %p127_p9 }
  0x1a   :  { %p130_p12 = pnand %p129_p11, %p123_p8 }
  0xa1   :  { %v32_v2 = vpop.xlane.xlu0 %31 }
  0xa2   :  { %v35_v3 = vmul.f32 0.0078125, %v32_v2 }
  0xa4   :  { %v37_v4 = vsub.f32 %v29_v0, %v35_v3 }
  0xa5   :  { %v34_v5 = vpop.xlane.xlu0 %33 }
  0xa6   :  { %v36_v6 = vmul.f32 0.0078125, %v34_v5  ;;  %v39_v7 = vmul.f32 %v37_v4, %v37_v4 }
  0xa8   :  { %v38_v8 = vsub.f32 %v30_v1, %v36_v6  ;;  %41 = vadd.xlane.f32.xlu1 %v39_v7 }
  0xaa   :  { %v40_v9 = vmul.f32 %v38_v8, %v38_v8 }
  0xac   :  { %43 = vadd.xlane.f32.xlu1 %v40_v9 }
 0x135   :  { %v42_v10 = vpop.xlane.xlu1 %41 }
 0x136   :  { %v45_v11 = vmul.f32 0.0078125, %v42_v10 }
 0x138   :  { %v47_v12 = vadd.f32 1e-05, %v45_v11 }
 0x139   :  { %v44_v13 = vpop.xlane.xlu1 %43 }
 0x13a   :  { %96 = vrsqrt.f32 %v47_v12  ;;  %v46_v14 = vmul.f32 0.0078125, %v44_v13 }
 0x13c   :  { %v48_v15 = vadd.f32 1e-05, %v46_v14 }
 0x13e   :  { %98 = vrsqrt.f32 %v48_v15 }
 0x144   :  { %v97_v17 = vpop.eup %96 }
 0x145   :  { %v58_v18 = vmul.f32 %v97_v17, %v90_v16 }
 0x147   :  { %v60_v20 = vmul.f32 %v58_v18, %v37_v4 }
 0x148   :  { %v99_v21 = vpop.eup %98 }
 0x149   :  { %v59_v22 = vmul.f32 %v99_v21, %v90_v16  ;;  %v69_v23 = vadd.f32 %v91_v19, %v60_v20 }
 0x14b   :  { %v61_v24 = vmul.f32 %v59_v22, %v38_v8  ;;  %71 = vst [vmem:[#allocation5] sm:$0xff] %v69_v23 }
 0x14d   :  { %v70_v25 = vadd.f32 %v91_v19, %v61_v24 }
 0x14f   :  { %72 = vst [vmem:[#allocation5 + $0x8] sm:$0xff] %v70_v25 }
 0x150   :  { %133 = shalt.err (!%p130_p12)
}
 0x151   :  { %s134_s5 = scalar_lea.hbm %s211_s3, 256 }
 0x152   :  { %p135_p13 = scmp.ne.s32.totalorder %s211_s3, %s134_s5  ;;  %p138_p0 = scmp.lt.u32.totalorder %s134_s5, %s211_s3 }
 0x154   :  { %p140_p1 = pnand %p138_p0, %p135_p13 }
 0x156   :  { %143 = shalt.err (!%p140_p1)
}
 0x157   :  { %84 = dma.vmem_to_hbm [thread:$0]  %s79_s30, 256, %s211_s3, [#allocation4], %s149_s22, %s149_s22, %s150_s23  }
 0x158   :  { %146 = dma.done.wait [#allocation4], 256  }
 0x159   :  { %147 = vsyncadd [#allocation4], 4294967040 }
 0x15a   :  { %88 = vsyncpa [#allocation3], 1 }
 0x15b   :  { %89 = vsyncpa [#allocation4], 1 }

</bundles_post_ra>
